<compile_context>
chip_gen: v7x
topology: tpu7x:2x2x1
jax: 0.10.0
libtpu: 0.0.40
codegen_flags: <defaults>
</compile_context>

<pallas_src>
import functools
import math

import jax
import jax.numpy as jnp
from jax.experimental import pallas as pl
from jax.experimental.pallas import tpu as pltpu


def _cdiv(a, b):
    return -(-a // b)


# ---------------------------------------------------------------------------
# (out_size, in_size) bicubic interpolation matrix (PyTorch semantics).
# ---------------------------------------------------------------------------
def _cubic_weight(t, a=-0.75):
    at = jnp.abs(t)
    at2 = at * at
    at3 = at2 * at
    w_near = (a + 2.0) * at3 - (a + 3.0) * at2 + 1.0            # |t| <= 1
    w_far = a * at3 - 5.0 * a * at2 + 8.0 * a * at - 4.0 * a    # 1 < |t| < 2
    return jnp.where(at <= 1.0, w_near, jnp.where(at < 2.0, w_far, 0.0))


def _bicubic_matrix(in_size: int, out_size: int, dtype=jnp.float32):
    scale = in_size / out_size
    out_idx = jnp.arange(out_size, dtype=jnp.float32)
    src = (out_idx + 0.5) * scale - 0.5                  # half-pixel centers
    base = jnp.floor(src)
    taps = jnp.arange(-1, 3, dtype=jnp.float32)          # 4 taps
    tap_pos = base[:, None] + taps[None, :]              # (out, 4)
    w = _cubic_weight(src[:, None] - tap_pos)            # (out, 4), sums to 1
    tap_idx = jnp.clip(tap_pos, 0, in_size - 1).astype(jnp.int32)  # edge clamp
    mat = jnp.zeros((out_size, in_size), jnp.float32)
    mat = mat.at[jnp.arange(out_size)[:, None], tap_idx].add(w)
    return mat.astype(dtype)


# ---------------------------------------------------------------------------
# Kernel: one block of `bp` (n, c) planes per grid step.
# ---------------------------------------------------------------------------
def _resize_kernel(wh_ref, ww_ref, x_ref, o_ref, *, bp, h_out, compute_dtype):
    x = x_ref[...].astype(compute_dtype)                     # (bp, H_in, W_in)
    wh = wh_ref[...]                                          # (H_out, H_in)
    ww = ww_ref[...]                                          # (W_out, W_in)

    # Height pass: batched 3Dx3D contraction over H_in (flash-attn style dot).
    # TODO(synk): single 'oh,bhw->obw' contraction once Mosaic dot_general
    #   supports rank-2 x rank-3 without batch dims (drops the Wh broadcast).
    wh_b = jnp.broadcast_to(wh[None, :, :], (bp,) + wh.shape)
    t = jnp.einsum('boh,bhw->bow', wh_b, x,
                   preferred_element_type=jnp.float32)        # (bp, H_out, W_in)

    # Width pass: fold (plane, out_row) into M -> one big NT matmul; result is
    # stored as a lane-dense (W_out, bp*H_out) slab (contraction on last dims,
    # no in-kernel transpose of the large operand).
    t2 = t.astype(compute_dtype).reshape(bp * h_out, t.shape[-1])
    out = jnp.einsum('jq,mq->jm', ww, t2,
                     preferred_element_type=jnp.float32)      # (W_out, bp*H_out)
    o_ref[0] = out.astype(o_ref.dtype)


# ---------------------------------------------------------------------------
# Plane-block / VMEM-budget selection (generation aware).
# ---------------------------------------------------------------------------
def _vmem_capacity_bytes():
    try:
        info = pltpu.get_tpu_info()
        cap = getattr(info, "vmem_capacity_bytes", None)
        if cap:
            return int(cap)
    except Exception:
        pass
    return 64 * 1024 * 1024   # conservative fallback: v7x per-TensorCore VMEM


def _choose_plane_block(nc, h_in, w_in, h_out, w_out, itemsize):
    """Returns (bp planes per grid step, derived vmem_limit_bytes)."""
    cap = _vmem_capacity_bytes()
    budget = int(cap * 0.40)   # ~51 MiB on 128 MiB chips, ~26 MiB on v7x

    # Per-plane footprint: double-buffered in/out tiles + f32 kernel temps.
    per_plane = (2 * h_in * w_in * itemsize
                 + 2 * h_out * w_out * itemsize
                 + 4 * (h_in * w_in          # compute-dtype copy of x
                        + h_out * h_in       # broadcast Wh slice
                        + h_out * w_in       # height-pass intermediate
                        + h_out * w_out))    # width-pass f32 result
    # Resident weights (constant index map; pipeline still holds 2 buffers).
    weight_bytes = 2 * 4 * (h_out * h_in + w_out * w_in)
    bp_vmem = max(1, (budget - weight_bytes) // per_plane)

    # Grid depth: >= 4 steps when nc permits (>= 2 per v7x core, steady-state
    # double-buffering on single-core v5e/v6e); never 1 step unless nc == 1.
    min_steps = 4 if nc >= 4 else max(1, nc)
    bp_depth = max(1, nc // min_steps)

    bp_cap = int(max(1, min(bp_vmem, bp_depth, nc)))

    # Within the cap prefer: (1) bp*H_out a multiple of 128 (unmasked stores),
    # (2) bp dividing nc (no padded planes), (3) largest bp.
    def score(b):
        lane_dense = (b * h_out) % 128 == 0
        no_pad = nc % b == 0
        return (lane_dense, no_pad, b)

    bp = max(range(1, bp_cap + 1), key=score)

    # Derive the scoped-VMEM limit from the actual footprint (+ headroom).
    footprint = weight_bytes + bp * per_plane
    vmem_limit = max(int(1.25 * footprint) + (4 << 20), 32 << 20)
    vmem_limit = min(vmem_limit, int(0.75 * cap))
    vmem_limit = max(vmem_limit, 16 << 20)
    return bp, vmem_limit


# ---------------------------------------------------------------------------
# Wrapper: equivalent of T.Resize(x1.size(3), BICUBIC)(x2) for NCHW tensors.
# ---------------------------------------------------------------------------
def bicubic_resize(x1, x2):
    target = int(x1.shape[3])
    n, c, h_in, w_in = x2.shape

    # torchvision Resize(int): match the *smaller* edge, keep aspect ratio.
    if h_in <= w_in:
        h_out = target
        w_out = max(1, int(target * w_in / h_in))
    else:
        w_out = target
        h_out = max(1, int(target * h_in / w_in))

    # bf16 inputs run the MXU in bf16 (f32 accumulate); f32 stays f32.
    compute_dtype = jnp.bfloat16 if x2.dtype == jnp.bfloat16 else jnp.float32
    wh = _bicubic_matrix(h_in, h_out, dtype=compute_dtype)   # (H_out, H_in)
    ww = _bicubic_matrix(w_in, w_out, dtype=compute_dtype)   # (W_out, W_in)

    nc = n * c
    bp, vmem_limit = _choose_plane_block(nc, h_in, w_in, h_out, w_out,
                                         x2.dtype.itemsize)
    grid = _cdiv(nc, bp)
    nc_pad = grid * bp

    x_flat = x2.reshape(nc, h_in, w_in)
    if nc_pad != nc:
        x_flat = jnp.pad(x_flat, ((0, nc_pad - nc), (0, 0), (0, 0)))

    kernel = functools.partial(_resize_kernel, bp=bp, h_out=h_out,
                               compute_dtype=compute_dtype)
    out_slab = pl.pallas_call(
        kernel,
        out_shape=jax.ShapeDtypeStruct((grid, w_out, bp * h_out), x2.dtype),
        grid_spec=pltpu.PrefetchScalarGridSpec(
            num_scalar_prefetch=0,
            grid=(grid,),
            in_specs=[
                pl.BlockSpec((h_out, h_in), lambda b: (0, 0)),         # Wh (resident)
                pl.BlockSpec((w_out, w_in), lambda b: (0, 0)),         # Ww (resident)
                pl.BlockSpec((bp, h_in, w_in), lambda b: (b, 0, 0)),   # plane block
            ],
            out_specs=pl.BlockSpec((1, w_out, bp * h_out), lambda b: (b, 0, 0)),
        ),
        compiler_params=pltpu.CompilerParams(
            dimension_semantics=("parallel",),
            vmem_limit_bytes=vmem_limit,
        ),
    )(wh, ww, x_flat)

    # Layout plumbing back to NCHW (trace-time XLA reshape/transpose).
    out = out_slab.reshape(grid, w_out, bp, h_out)
    out = out.transpose(0, 2, 3, 1).reshape(nc_pad, h_out, w_out)
    return out[:nc].reshape(n, c, h_out, w_out)


if __name__ == "__main__":
    key = jax.random.PRNGKey(0)
    k1, k2 = jax.random.split(key)
    # x1 only supplies the target size via its width (dim=3).
    x1 = jax.random.normal(k1, (2, 4, 16, 16), dtype=jnp.float32)
    # x2 is the image to be (up)sampled bicubically: 8x8 -> 16x16.
    x2 = jax.random.normal(k2, (2, 4, 8, 8), dtype=jnp.float32)

    out = bicubic_resize(x1, x2)
    jax.block_until_ready(out)
    assert out.shape == (2, 4, 16, 16), out.shape

    # Sanity check against a pure-JAX reference built from the same weights.
    wh = _bicubic_matrix(8, 16)
    ww = _bicubic_matrix(8, 16)
    ref = jnp.einsum('ih,jw,nchw->ncij', wh, ww, x2)
    err = float(jnp.max(jnp.abs(out - ref)))
    assert err < 5e-2, f"max abs error {err}"

    print("KERNEL_OK")
</pallas_src>

<mosaic_0001>
module attributes {stable_mosaic.version = 11 : i64} {
  func.func @_resize_kernel(%arg0: i32, %arg1: memref<16x8xf32, #tpu.memory_space<vmem>>, %arg2: memref<16x8xf32, #tpu.memory_space<vmem>>, %arg3: memref<2x8x8xf32, #tpu.memory_space<vmem>>, %arg4: memref<1x16x32xf32, #tpu.memory_space<vmem>>) attributes {dimension_semantics = [#tpu.dimension_semantics<parallel>], iteration_bounds = array<i64: 4>, scalar_prefetch = 0 : i64, scratch_operands = 0 : i64, tpu.core_type = #tpu.core_type<tc>, window_params = [{pipeline_mode = #tpu.pipeline_mode<synchronous>, transform_indices = @transform_0, window_bounds = array<i64: 16, 8>}, {pipeline_mode = #tpu.pipeline_mode<synchronous>, transform_indices = @transform_1, window_bounds = array<i64: 16, 8>}, {transform_indices = @transform_2, window_bounds = array<i64: 2, 8, 8>}, {transform_indices = @transform_3, window_bounds = array<i64: 1, 16, 32>}]} {
    %c0 = arith.constant 0 : index
    %c0_0 = arith.constant 0 : index
    %c0_1 = arith.constant 0 : index
    %0 = vector.load %arg3[%c0, %c0_0, %c0_1] : memref<2x8x8xf32, #tpu.memory_space<vmem>>, vector<2x8x8xf32>
    %c0_2 = arith.constant 0 : index
    %c0_3 = arith.constant 0 : index
    %1 = vector.load %arg1[%c0_2, %c0_3] : memref<16x8xf32, #tpu.memory_space<vmem>>, vector<16x8xf32>
    %c0_4 = arith.constant 0 : index
    %c0_5 = arith.constant 0 : index
    %2 = vector.load %arg2[%c0_4, %c0_5] : memref<16x8xf32, #tpu.memory_space<vmem>>, vector<16x8xf32>
    %3 = vector.shape_cast %1 : vector<16x8xf32> to vector<1x16x8xf32>
    %4 = vector.shape_cast %3 : vector<1x16x8xf32> to vector<1x16x8xf32>
    %5 = vector.broadcast %4 : vector<1x16x8xf32> to vector<2x16x8xf32>
    "tpu.trace_start"() <{level = 10 : i32, message = "boh,bhw->bow"}> : () -> ()
    %cst = arith.constant dense<0.000000e+00> : vector<2x16x8xf32>
    %6 = tpu.matmul %5, %0, %cst {dimension_numbers = #tpu.dot_dimension_numbers<[2], [1], [1], [2], [0, 0, 0, 1, 1, 2], [0], [0]>} : vector<2x16x8xf32>, vector<2x8x8xf32>, vector<2x16x8xf32> -> vector<2x16x8xf32>
    "tpu.trace_stop"() : () -> ()
    %7 = vector.shape_cast %6 : vector<2x16x8xf32> to vector<32x8xf32>
    "tpu.trace_start"() <{level = 10 : i32, message = "jq,mq->jm"}> : () -> ()
    %cst_6 = arith.constant dense<0.000000e+00> : vector<16x32xf32>
    %8 = tpu.matmul %2, %7, %cst_6 {dimension_numbers = #tpu.dot_dimension_numbers<[1], [1], [0], [0], [0, 0, 1, 0], [], []>} : vector<16x8xf32>, vector<32x8xf32>, vector<16x32xf32> -> vector<16x32xf32>
    "tpu.trace_stop"() : () -> ()
    %c0_7 = arith.constant 0 : index
    %c0_8 = arith.constant 0 : index
    %c0_9 = arith.constant 0 : index
    %9 = vector.load %arg4[%c0_7, %c0_8, %c0_9] : memref<1x16x32xf32, #tpu.memory_space<vmem>>, vector<1x16x32xf32>
    %10 = vector.shape_cast %9 : vector<1x16x32xf32> to vector<16x32xf32>
    %11 = vector.shape_cast %8 : vector<16x32xf32> to vector<1x16x32xf32>
    tpu.vector_store %arg4[%c0_7, %c0_8, %c0_9], %11 {strides = array<i32>} : memref<1x16x32xf32, #tpu.memory_space<vmem>>, vector<1x16x32xf32>,
    return
  }
  func.func @transform_0(%arg0: i32) -> (i32, i32) {
    %c0_i32 = arith.constant 0 : i32
    %c0_i32_0 = arith.constant 0 : i32
    %c0_i32_1 = arith.constant 0 : i32
    return %c0_i32, %c0_i32_0 : i32, i32
  }
  func.func @transform_1(%arg0: i32) -> (i32, i32) {
    %c0_i32 = arith.constant 0 : i32
    %c0_i32_0 = arith.constant 0 : i32
    %c0_i32_1 = arith.constant 0 : i32
    return %c0_i32, %c0_i32_0 : i32, i32
  }
  func.func @transform_2(%arg0: i32) -> (i32, i32, i32) {
    %c0_i32 = arith.constant 0 : i32
    %c0_i32_0 = arith.constant 0 : i32
    %c0_i32_1 = arith.constant 0 : i32
    return %arg0, %c0_i32, %c0_i32_0 : i32, i32, i32
  }
  func.func @transform_3(%arg0: i32) -> (i32, i32, i32) {
    %c0_i32 = arith.constant 0 : i32
    %c0_i32_0 = arith.constant 0 : i32
    %c0_i32_1 = arith.constant 0 : i32
    return %arg0, %c0_i32, %c0_i32_0 : i32, i32, i32
  }
}

</mosaic_0001>

<bundles_post_ra>
// kernel: tpu_custom_call.1
= control target key start
LH: loop header
LB: loop body
LE: loop exit
PB: predicated region body
PF: predicated region fallthrough
CT: control target
= control target key end

     0   :  { %8 = vsyncpa [#allocation3], 0  ;;  %s965_s0 = inlined_call_operand.vmem [shape: f32[16,8], index: 0, kind: input, shape index: {}]   ;;  %s966_s1 = inlined_call_operand.vmem [shape: f32[16,8], index: 1, kind: input, shape index: {}]   ;;  %s967_s2 = inlined_call_operand.hbm [shape: f32[8,8,8], index: 2, kind: input, shape index: {}]   ;;  %s968_s3 = inlined_call_operand.hbm [shape: f32[4,16,32], index: 3, kind: output, shape index: {}]  }
   0x1   :  { %10 = vsyncpa [#allocation3 + $0x1], 0 }
   0x2   :  { %11 = vsyncpa [#allocation4], 0 }
   0x3   :  { %13 = vsyncpa [#allocation4 + $0x1], 0  ;;  %s781_s12 = smov 0   ;;  %s783_s13 = smov 0  }
   0x4   :  { %s785_s14 = smov 0   ;;  %s787_s15 = smov 0  }
   0x5 LB: > { %s802_s16 = sadd.s32 4294967295, %s753_s15   ;;  %s536_s17 = sadd.s32 4294967294, %s753_s15   ;;  %s753_s15 = sphi %s787_s15, %s980_s15   ;;  %s749_s14 = sphi %s785_s14, %s979_s14   ;;  %s745_s13 = sphi %s783_s13, %s978_s13   ;;  %s741_s12 = sphi %s781_s12, %s977_s12  }
   0x6   : > { %s806_s18 = sadd.s32 1, %s753_s15   ;;  %s68_s19 = sadd.s32 1, %s749_s14 }
   0x7   : > { %s65_s20 = ssub.s32 %s753_s15, %s806_s18  ;;  %p75_p0 = scmp.ne.s32.totalorder %s749_s14, %s745_s13 }
   0x8   : > { %p66_p1 = scmp.eq.s32.totalorder %s65_s20, 0  ;;  %p76_p2 = scmp.eq.s32.totalorder %s753_s15, 0 }
   0x9   : > { %p81_p3 = scmp.ne.s32.totalorder %s745_s13, %s741_s12  ;;  %p82_p4 = scmp.eq.s32.totalorder %s802_s16, 0 }
   0xa   : > { %s818_s21 = scalar_select %p66_p1, %s749_s14, %s68_s19  }
   0xb   : > { %p820_p5 = por %p76_p2, %p75_p0  ;;  %p824_p6 = por %p82_p4, %p81_p3 }
   0xc   : > { %p105_p7 = scmp.eq.s32.totalorder %s802_s16, 3  ;;  %p111_p8 = scmp.eq.s32.totalorder %s536_s17, 3 }
   0xd   : > { %p619_p9 = scmp.lt.s32.totalorder %s753_s15, 4  ;;  %s137_s26 = sand.u32 1, %s749_s14  }
   0xe   : > { %p830_p10 = por %p105_p7, %p75_p0  ;;  %p834_p11 = por %p111_p8, %p81_p3 }
   0xf   : > { %s560_s27 = sshll.u32 %s753_s15, 8  ;;  %s539_s28 = sshll.u32 %s137_s26, 4 }
  0x10   : > { %s972_s24 = scalar_select %p830_p10, 1, 0 }
  0x11   : > { %s973_s25 = scalar_select %p834_p11, 1, 0 }
  0x12   : > { %s843_s4 = scalar_lea.hbm %s967_s2, %s560_s27  ;;  %s141_s5 = scalar_lea.vmem [#allocation2], %s539_s28 }
  0x13   : > { %s148_s6 = sshll.u32 %s141_s5, 4  ;;  %p847_p12 = pnand %p619_p9, %p820_p5  ;;  %s851_s6 = int_to_ptr.vmem [resolvable:$true] %s148_s6 }
  0x14   : > { %s853_s8 = scalar_lea.sflag [#allocation3], %s137_s26  ;;  %s657_s9 = scalar_lea.hbm %s843_s4, 256 }
  0x15   : > { %p658_p13 = scmp.ne.s32.totalorder %s843_s4, %s657_s9  ;;  %p659_p0 = pneg %p847_p12 }
  0x16   : > { %s662_s17 = scalar_lea.hbm %s967_s2, 1024  ;;  %p663_p3 = scmp.lt.u32.totalorder %s843_s4, %s967_s2 }
  0x17   : > { %p660_p1 = pnand %p659_p0, %p658_p13  ;;  %p664_p4 = scmp.lt.u32.totalorder %s662_s17, %s657_s9 }
  0x18   : > { %p666_p7 = scmp.lt.u32.totalorder %s657_s9, %s843_s4 }
  0x19   : > { %p661_p2 = pneg %p660_p1  ;;  %p665_p5 = por %p664_p4, %p663_p3 }
  0x1b   : > { %p667_p8 = por %p666_p7, %p665_p5 }
  0x1d   : > { %p668_p9 = pnand %p667_p8, %p661_p2 }
  0x1f   : > { %671 = shalt.err (!%p668_p9)
}
  0x20   : > { %s672_s22 = scalar_lea.vmem %s851_s6, 256  ;;  %s755_s26 = smov [#allocation2]  }
  0x21   : > { %p673_p13 = scmp.ne.s32.totalorder %s851_s6, %s672_s22  ;;  %s677_s27 = sshll.u32 %s755_s26, 4  ;;  %s678_s27 = int_to_ptr.vmem [resolvable:$false] %s677_s27 }
  0x22   : > { %s679_s28 = scalar_lea.vmem %s678_s27, 512  ;;  %p680_p10 = scmp.lt.s32.totalorder %s851_s6, %s678_s27 }
  0x23   : > { %p675_p1 = pnand %p673_p13, %p659_p0  ;;  %p681_p3 = scmp.lt.s32.totalorder %s679_s28, %s672_s22 }
  0x25   : > { %p676_p11 = pneg %p675_p1  ;;  %p682_p4 = por %p681_p3, %p680_p10 }
  0x27   : > { %p683_p5 = pnand %p682_p4, %p676_p11 }
  0x29   : > { %686 = shalt.err (!%p683_p5)
}
  0x2a   : > { %s756_s29 = smov 128   ;;  %s757_s30 = smov 8  }
  0x2b   : > { %614 = dma.hbm_to_vmem [thread:$0]  (!%p847_p12), %s843_s4, 256, %s851_s6, %s853_s8, %s756_s29, %s756_s29, %s757_s30  }
  0x2c   : > { %p542_p0 = scmp.ge.s32.totalorder %s753_s15, 1  ;;  %p156_p2 = scmp.lt.s32.totalorder %s753_s15, 5 }
  0x2e   : > { %p157_p7 = pnand %p542_p0, %p156_p2 }
  0x2f   : > { %s884_s5 = sand.u32 (!%p157_p7), 1, %s745_s13  }
  0x30   : > { %160 = sbr.rel (%p157_p7) target bundleno = 518 (0x206), region = 32  ;;  %s543_s9 = sshll.u32 (!%p157_p7), %s884_s5, 4 }
  0x31   : > { %s163_s10 = scalar_lea.sflag (!%p157_p7), [#allocation3], %s884_s5  ;;  %s166_s11 = scalar_lea.vmem (!%p157_p7), [#allocation2], %s543_s9 }
  0x37   : > { %732 = dma.done.wait (%p824_p6), %s163_s10, 256  }
  0x38   : > { %734 = vsyncadd (%p824_p6), %s163_s10, 4294967040  ;;  %vm196_vm0 = vcmask 64512   ;;  %v190_v0 = vld [vmem:[%s166_s11] sm:$0xff]  ;;  %v193_v2 = vld [vmem:[%s965_s0 + $0x8] sm:$0xff]  ;;  %s188_s22 = scalar_lea.vmem [#allocation5], %s543_s9  ;;  %s561_s27 = sshll.u32 %s802_s16, 8 }
  0x39   : > { %v192_v1 = vld [vmem:[%s965_s0] sm:$0xff]  ;;  %574 = vmatprep.subr.mxu1 %v190_v0  ;;  %v191_v3 = vld [vmem:[%s166_s11 + $0x8] sm:$0xff]  ;;  %vm596_vm1 = vmpackc.low %vm196_vm0, %vm196_vm0  ;;  %s463_s26 = sshll.u32 %s188_s22, 4  ;;  %vm446_vm2 = vcmask 261120   ;;  %s922_s30 = scalar_lea.hbm %s968_s3, %s561_s27  ;;  %s917_s26 = int_to_ptr.vmem [resolvable:$true] %s463_s26 }
  0x3a   : > { %576 = vmatprep.mubr.msk.f32.mxu1 %vm196_vm0, %v192_v1  ;;  %575 = vmatpush3.msra.mxu1 %v190_v0  ;;  %v194_v4 = vld [vmem:[%s966_s1] sm:$0xff]  ;;  %v195_v11 = vld [vmem:[%s966_s1 + $0x8] sm:$0xff]  ;;  %s450_s10 = scalar_lea.sflag [#allocation4], %s884_s5  ;;  %s687_s11 = scalar_lea.vmem %s917_s26, 256 }
  0x3b   : > { %577 = vmatmul.mubr.msk.f32.vlgmr.msra.gmra.mrb[0].mxu1 %vm196_vm0, %v193_v2  ;;  %579 = vmatprep.subr.mxu1 %v191_v3  ;;  %p688_p6 = scmp.ne.s32.totalorder %s917_s26, %s687_s11  ;;  %p975_p10 = scmp.ne.s32.totalorder %s972_s24, 0 }
  0x3c   : > { %580 = vmatpush3.msra.mxu1 %v191_v3  ;;  %581 = vmatprep.mubr.msk.f32.mxu1 %vm196_vm0, %v192_v1  ;;  %s758_s16 = smov [#allocation5]  }
  0x3d   : > { %592 = vmatprep.mubr.msk.f32.mxu0 %vm196_vm0, %v194_v4  ;;  %p689_p11 = pnand %p688_p6, %p975_p10  ;;  %s691_s9 = sshll.u32 %s758_s16, 4  ;;  %s692_s9 = int_to_ptr.vmem [resolvable:$false] %s691_s9 }
  0x3e   : > { %s693_s4 = scalar_lea.vmem %s692_s9, 512  ;;  %p694_p8 = scmp.lt.s32.totalorder %s917_s26, %s692_s9 }
  0x3f   : > { %582 = vmatmul.mubr.msk.f32.vlgmr.msra.gmra.mrb[2].mxu1 %vm196_vm0, %v193_v2  ;;  %p690_p12 = pneg %p689_p11  ;;  %p695_p9 = scmp.lt.s32.totalorder %s693_s4, %s687_s11 }
  0x41   : > { %p696_p13 = por %p695_p9, %p694_p8 }
  0x43   : > { %p697_p1 = pnand %p696_p13, %p690_p12 }
 0x10e   : > { %v578_v5 = vpop.f32.mrb[0].mxu1 }
 0x10f   : > { %v269_v6 = vpop.f32.mrb[1].mxu1 }
 0x110   : > { %v595_v7 = vpack.c.bf16 %v578_v5, %v269_v6 }
 0x112   : > { %597 = vmatprep.subr.msk.bf16.mxu0 %vm596_vm1, %v595_v7  ;;  %v583_v8 = vpop.f32.mrb[2].mxu1 }
 0x113   : > { %600 = vmatpush3.bf16.xpose.msk.msra.mxu0 %vm596_vm1, %v595_v7  ;;  %v344_v9 = vpop.f32.mrb[3].mxu1 }
 0x114   : > { %v601_v10 = vpack.c.bf16 %v583_v8, %v344_v9 }
 0x116   : > { %603 = vmatprep.subr.msk.bf16.mxu0 %vm596_vm1, %v601_v10 }
 0x11b   : > { %606 = vmatpush3.bf16.xpose.msk.msra.mxu0 %vm596_vm1, %v601_v10 }
 0x122   : > { %593 = vmatmul.mubr.msk.f32.vlgmr.msra.gmra.mrb[0].mxu0 %vm196_vm0, %v195_v11 }
 0x1f5   : > { %v594_v12 = vpop.f32.mrb[0].mxu0 }
 0x1f6   : > { %448 = vst.msk [vmem:[%s188_s22 + $0x8] sm:$0xff] %vm446_vm2, %v594_v12  ;;  %v437_v13 = vpop.f32.mrb[1].mxu0 }
 0x1f7   : > { %447 = vst.msk [vmem:[%s188_s22] sm:$0xff] %vm446_vm2, %v437_v13 }
 0x1f8   : > { %700 = shalt.err (!%p697_p1)
}
 0x1f9   : > { %s701_s6 = scalar_lea.hbm %s922_s30, 256  ;;  %s705_s23 = scalar_lea.hbm %s968_s3, 1024 }
 0x1fa   : > { %p702_p3 = scmp.ne.s32.totalorder %s922_s30, %s701_s6  ;;  %p706_p0 = scmp.lt.u32.totalorder %s922_s30, %s968_s3 }
 0x1fb   : > { %p707_p2 = scmp.lt.u32.totalorder %s705_s23, %s701_s6  ;;  %p709_p6 = scmp.lt.u32.totalorder %s701_s6, %s922_s30 }
 0x1fc   : > { %p703_p4 = pnand %p702_p3, %p975_p10 }
 0x1fd   : > { %p708_p7 = por %p707_p2, %p706_p0 }
 0x1fe   : > { %p704_p5 = pneg %p703_p4 }
 0x1ff   : > { %p710_p11 = por %p709_p6, %p708_p7 }
 0x201   : > { %p711_p12 = pnand %p710_p11, %p704_p5 }
 0x203   : > { %714 = shalt.err (!%p711_p12)
}
 0x204   : > { %s759_s20 = smov 128   ;;  %s760_s22 = smov 8  }
 0x205   : > { %609 = dma.vmem_to_hbm [thread:$0]  (%p975_p10), %s917_s26, 256, %s922_s30, %s450_s10, %s759_s20, %s759_s20, %s760_s22  }
 0x206 PF: > { %p620_p8 = scmp.ge.s32.totalorder %s753_s15, 2  ;;  %s478_s27 = sand.u32 1, %s741_s12  }
 0x207   : > { %p976_p9 = scmp.ne.s32.totalorder %s973_s25, 0  ;;  %s479_s28 = scalar_lea.sflag [#allocation4], %s478_s27 }
 0x209   : > { %p616_p13 = pnand %p620_p8, %p976_p9 }
 0x20b   : > { %736 = dma.done.wait (!%p616_p13), %s479_s28, 256  }
 0x20c   : > { %738 = vsyncadd (!%p616_p13), %s479_s28, 4294967040  ;;  %p16_p1 = scmp.ge.s32.totalorder %s806_s18, 6   ;;  %s977_s12 = smov %s745_s13 }
 0x20d   : > { %s978_s13 = smov %s749_s14  ;;  %s979_s14 = smov %s818_s21 }
 0x20e   : > { %s980_s15 = smov %s806_s18  ;;  %18 = sbr.rel (!%p16_p1) target bundleno = 5 (0x5), region = 77 }
 0x215   :  { %484 = vsyncpa [#allocation3], 1 }
 0x216   :  { %486 = vsyncpa [#allocation3 + $0x1], 1 }
 0x217   :  { %487 = vsyncpa [#allocation4], 1 }
 0x218   :  { %489 = vsyncpa [#allocation4 + $0x1], 1 }

</bundles_post_ra>
